<compile_context>
chip_gen: v6e
topology: v6e:2x2x1
jax: 0.10.0
libtpu: 0.0.40
codegen_flags: <defaults>
</compile_context>

<pallas_src>
import functools

import numpy as np
import jax
import jax.numpy as jnp
from jax.experimental import pallas as pl
from jax.experimental.pallas import tpu as pltpu


_BIG = 1e9  # sentinel for padded batch rows -> exp(-K*BIG) == 0.0


def _round_up(a, b):
    return (a + b - 1) // b * b


def _proj_kernel(x_ref, t_ref, m_ref, *, batch, block_rows):
    # m = x @ T, hoisted out of the O(B^2) hot path; padded-row sentinel fused.
    val = jnp.dot(x_ref[...], t_ref[...], preferred_element_type=jnp.float32)
    row = (pl.program_id(0) * block_rows
           + jax.lax.broadcasted_iota(jnp.int32, val.shape, 0))
    val = jnp.where(row < batch, val, jnp.float32(_BIG))
    m_ref[...] = val.astype(m_ref.dtype)


def _pairwise_kernel(ti_ref, tj_ref, mi_ref, mjp_ref, s_ref, r_ref,
                     o_row_ref, o_col_ref):
    # One upper-triangular tile pair (ti, tj) of the pairwise stage.
    #   mi_ref : (TB, OKp)             i-side rows (replicated along lanes here)
    #   mjp_ref: (TB//G, G*OKp)        G consecutive j-rows packed along lanes
    #   s_ref  : (G*OKp, OLanes) bf16  block-diag group-sum, -1 entries (negation folded)
    #   r_ref  : (OLanes, FLanes) f32  folds the G lane groups back onto O features
    #   o_row  : (Bp, FLanes) f32      resident accumulator: contributions to i-rows
    #   o_col  : (Bp//G, OLanes) f32   resident accumulator: contributions to j-rows
    #                                  (kept lane-packed; unpacked in the wrapper)
    p = pl.program_id(0)

    @pl.when(p == 0)
    def _init():
        o_row_ref[...] = jnp.zeros_like(o_row_ref)
        o_col_ref[...] = jnp.zeros_like(o_col_ref)

    ti = ti_ref[p]
    tj = tj_ref[p]

    mi = mi_ref[...]                                    # (TB, OKp)
    mjp = mjp_ref[...]                                  # (TBjg, G*OKp)
    tb, okp = mi.shape
    tbjg, gokp = mjp.shape
    g = gokp // okp
    olanes = s_ref.shape[1]

    # replicate the i-rows along lanes in-kernel (was a wrapper-side HBM tile)
    mi_rep = jnp.tile(mi, (1, g)) if g > 1 else mi      # (TB, G*OKp)

    # pairwise |m_i - m_j| on the VPU (bf16 on v6e/v7x, f32 on v5e/older)
    d = jnp.abs(mi_rep[:, None, :] - mjp[None, :, :])   # (TB, TBjg, G*OKp)
    d2 = d.reshape(tb * tbjg, gokp)

    # negated group-sum over kernel_dim: bf16 MXU inputs, f32 accumulation
    ad = jnp.dot(d2.astype(jnp.bfloat16), s_ref[...],
                 preferred_element_type=jnp.float32)    # (rows, OLanes) = -L1
    e = jnp.exp(ad)                                     # exp(-L1), lane-dense EUP
    e3 = e.reshape(tb, tbjg, olanes)

    # contribution to the i-rows: sum over packed j, fold lane groups -> O feats
    part_row = jnp.dot(jnp.sum(e3, axis=1), r_ref[...],
                       preferred_element_type=jnp.float32)      # (TB, FLanes)
    r0 = pl.multiple_of(ti * tb, tb)
    o_row_ref[pl.ds(r0, tb), :] += part_row

    # symmetric contribution to the j-rows (skip on the diagonal tile, which
    # already contains every ordered pair of its own rows)
    @pl.when(ti != tj)
    def _col():
        part_col = jnp.sum(e3, axis=0)                  # (TBjg, OLanes), packed
        c0 = pl.multiple_of(tj * tbjg, tbjg)
        o_col_ref[pl.ds(c0, tbjg), :] += part_col


def minibatch_discrimination(x, T, out_features, kernel_dim, *,
                             block=128, bf16_diff=None, wide_lanes=None):
    B, Fin = x.shape
    O, K = out_features, kernel_dim
    OK = O * K
    assert T.shape == (Fin, OK)
    OKp = _round_up(OK, 128)

    # ---- generation-aware choices (v6e/v7x: bf16 VALU + 256-wide MXU) ----
    if bf16_diff is None or wide_lanes is None:
        kind = ""
        try:
            kind = jax.devices()[0].device_kind.lower()
        except Exception:
            pass
        old_gen = any(t in kind for t in ("v2", "v3", "v4", "v5"))
        if bf16_diff is None:
            bf16_diff = not old_gen       # f32 subtract/abs on v5e and older
        if wide_lanes is None:
            wide_lanes = not old_gen      # 128-lane packing on v5e and older
    m_dtype = jnp.bfloat16 if bf16_diff else jnp.float32
    lane_target = 256 if wide_lanes else 128

    # lane-packing factor: pack G j-samples so the group-sum output fills
    # lane_target MXU output lanes
    G = 1
    for tgt in (lane_target, 128):
        if O <= tgt and tgt % O == 0:
            G = min(tgt // O, 32)
            break
    OLanes = _round_up(G * O, 128)
    FLanes = _round_up(O, 128)

    # ---- batch tiling: one tile size TB for both triangle sides ----
    unit = max(8, G)
    if _round_up(B, unit) <= block:
        TB = _round_up(B, unit)           # single tile: blocks == full dims
    else:
        TB = _round_up(block, 8 * G)      # keep packed j-tile 8-row aligned
    Bp = _round_up(B, TB)
    TBjg = TB // G
    nT = Bp // TB

    # upper-triangular tile pairs (each unordered pair visited exactly once)
    pairs = [(i, j) for i in range(nT) for j in range(i, nT)]
    ti_arr = jnp.asarray(np.array([p[0] for p in pairs], np.int32))
    tj_arr = jnp.asarray(np.array([p[1] for p in pairs], np.int32))
    nP = len(pairs)

    # ---- projection m = x @ T (once; padded-row sentinel fused in) ----
    x_pad = jnp.pad(x.astype(jnp.float32), ((0, Bp - B), (0, 0)))
    T_pad = jnp.pad(T.astype(jnp.float32), ((0, 0), (0, OKp - OK)))
    m = pl.pallas_call(
        functools.partial(_proj_kernel, batch=B, block_rows=TB),
        out_shape=jax.ShapeDtypeStruct((Bp, OKp), m_dtype),
        grid=(Bp // TB,),
        in_specs=[pl.BlockSpec((TB, Fin), lambda i: (i, 0)),
                  pl.BlockSpec((Fin, OKp), lambda i: (0, 0))],
        out_specs=pl.BlockSpec((TB, OKp), lambda i: (i, 0)),
        compiler_params=pltpu.CompilerParams(dimension_semantics=("parallel",)),
    )(x_pad, T_pad)

    # j-side lane packing is a free row-major reshape in HBM
    m_packed = m.reshape(Bp // G, G * OKp)

    # block-diagonal group-sum matrix (negation folded in) + lane-group fold
    s_small = np.zeros((OKp, O), np.float32)
    for o in range(O):
        s_small[o * K:(o + 1) * K, o] = -1.0
    s_blk = np.zeros((G * OKp, OLanes), np.float32)
    r_fold = np.zeros((OLanes, FLanes), np.float32)
    for g in range(G):
        s_blk[g * OKp:(g + 1) * OKp, g * O:(g + 1) * O] = s_small
        r_fold[g * O:(g + 1) * O, :O] = np.eye(O, dtype=np.float32)
    s_blk = jnp.asarray(s_blk, dtype=jnp.bfloat16)
    r_fold = jnp.asarray(r_fold, dtype=jnp.float32)

    grid_spec = pltpu.PrefetchScalarGridSpec(
        num_scalar_prefetch=2,
        grid=(nP,),
        in_specs=[
            pl.BlockSpec((TB, OKp), lambda p, ti, tj: (ti[p], 0)),
            pl.BlockSpec((TBjg, G * OKp), lambda p, ti, tj: (tj[p], 0)),
            pl.BlockSpec((G * OKp, OLanes), lambda p, ti, tj: (0, 0)),
            pl.BlockSpec((OLanes, FLanes), lambda p, ti, tj: (0, 0)),
        ],
        out_specs=[
            pl.BlockSpec((Bp, FLanes), lambda p, ti, tj: (0, 0)),
            pl.BlockSpec((Bp // G, OLanes), lambda p, ti, tj: (0, 0)),
        ],
    )
    out_row, out_col = pl.pallas_call(
        _pairwise_kernel,
        out_shape=(jax.ShapeDtypeStruct((Bp, FLanes), jnp.float32),
                   jax.ShapeDtypeStruct((Bp // G, OLanes), jnp.float32)),
        grid_spec=grid_spec,
        compiler_params=pltpu.CompilerParams(
            dimension_semantics=("arbitrary",),
            vmem_limit_bytes=32 * 1024 * 1024),
    )(ti_arr, tj_arr, m, m_packed, s_blk, r_fold)

    # unpack the lane-packed column contributions and combine (cheap XLA ops)
    col = out_col[:, :G * O].reshape(Bp, O)
    feat = out_row[:B, :O] + col[:B]
    return jnp.concatenate([x, feat.astype(x.dtype)], axis=1)


def _reference(x, T, out_features, kernel_dim):
    B = x.shape[0]
    m = jnp.dot(x, T, precision=jax.lax.Precision.HIGHEST)
    m = m.reshape(B, out_features, kernel_dim)
    diff = m[:, None, :, :] - m[None, :, :, :]                 # (B_i, B_j, O, K)
    abs_diff = jnp.sum(jnp.abs(diff), axis=3)                  # (B_i, B_j, O)
    out = jnp.sum(jnp.exp(-abs_diff), axis=1)                  # (B, O)
    return jnp.concatenate([x, out], axis=1)


if __name__ == "__main__":
    batch = 8
    in_features = 32
    out_features = 16
    kernel_dim = 8

    key = jax.random.PRNGKey(0)
    kx, kt = jax.random.split(key)
    x = jax.random.normal(kx, (batch, in_features), dtype=jnp.float32)
    # scale T so the pairwise exp terms are O(1e-2) and the check is meaningful
    T = 0.1 * jax.random.normal(kt, (in_features, out_features * kernel_dim),
                                dtype=jnp.float32)

    out = minibatch_discrimination(x, T, out_features, kernel_dim)
    out = jax.block_until_ready(out)

    ref = _reference(x, T, out_features, kernel_dim)
    assert out.shape == (batch, in_features + out_features)
    # bf16 MXU inputs (and bf16 diff on v6e/v7x) -> slightly looser tolerance
    assert jnp.allclose(out, ref, atol=5e-3, rtol=5e-3), "mismatch vs reference"

    print("KERNEL_OK")
</pallas_src>

<mosaic_0001>
module attributes {stable_mosaic.version = 11 : i64} {
  func.func @_proj_kernel(%arg0: i32, %arg1: memref<16x32xf32, #tpu.memory_space<vmem>>, %arg2: memref<32x128xf32, #tpu.memory_space<vmem>>, %arg3: memref<16x128xbf16, #tpu.memory_space<vmem>>) attributes {dimension_semantics = [#tpu.dimension_semantics<parallel>], iteration_bounds = array<i64: 1>, scalar_prefetch = 0 : i64, scratch_operands = 0 : i64, tpu.core_type = #tpu.core_type<tc>, window_params = [{transform_indices = @transform_0, window_bounds = array<i64: 16, 32>}, {pipeline_mode = #tpu.pipeline_mode<synchronous>, transform_indices = @transform_1, window_bounds = array<i64: 32, 128>}, {transform_indices = @transform_2, window_bounds = array<i64: 16, 128>}]} {
    %c0 = arith.constant 0 : index
    %c0_0 = arith.constant 0 : index
    %0 = vector.load %arg1[%c0, %c0_0] : memref<16x32xf32, #tpu.memory_space<vmem>>, vector<16x32xf32>
    %c0_1 = arith.constant 0 : index
    %c0_2 = arith.constant 0 : index
    %1 = vector.load %arg2[%c0_1, %c0_2] : memref<32x128xf32, #tpu.memory_space<vmem>>, vector<32x128xf32>
    %cst = arith.constant dense<0.000000e+00> : vector<16x128xf32>
    %2 = tpu.matmul %0, %1, %cst {dimension_numbers = #tpu.dot_dimension_numbers<[1], [0], [0], [1], [0, 0, 1, 1], [], []>} : vector<16x32xf32>, vector<32x128xf32>, vector<16x128xf32> -> vector<16x128xf32>
    %c16_i32 = arith.constant 16 : i32
    %3 = arith.muli %arg0, %c16_i32 : i32
    %4 = tpu.iota {dimensions = array<i32: 0>} : vector<16x128xi32>
    %5 = vector.broadcast %3 : i32 to vector<16x128xi32>
    %6 = arith.addi %5, %4 : vector<16x128xi32>
    %c8_i32 = arith.constant 8 : i32
    %7 = vector.broadcast %c8_i32 : i32 to vector<16x128xi32>
    %8 = arith.cmpi slt, %6, %7 : vector<16x128xi32>
    %cst_3 = arith.constant 1.000000e+09 : f32
    %9 = vector.broadcast %cst_3 : f32 to vector<16x128xf32>
    %10 = arith.select %8, %2, %9 : vector<16x128xi1>, vector<16x128xf32>
    %11 = arith.truncf %10 : vector<16x128xf32> to vector<16x128xbf16>
    %c0_4 = arith.constant 0 : index
    %c0_5 = arith.constant 0 : index
    %12 = vector.load %arg3[%c0_4, %c0_5] : memref<16x128xbf16, #tpu.memory_space<vmem>>, vector<16x128xbf16>
    tpu.vector_store %arg3[%c0_4, %c0_5], %11 {strides = array<i32>} : memref<16x128xbf16, #tpu.memory_space<vmem>>, vector<16x128xbf16>,
    return
  }
  func.func @transform_0(%arg0: i32) -> (i32, i32) {
    %c0_i32 = arith.constant 0 : i32
    %c0_i32_0 = arith.constant 0 : i32
    return %arg0, %c0_i32 : i32, i32
  }
  func.func @transform_1(%arg0: i32) -> (i32, i32) {
    %c0_i32 = arith.constant 0 : i32
    %c0_i32_0 = arith.constant 0 : i32
    %c0_i32_1 = arith.constant 0 : i32
    return %c0_i32, %c0_i32_0 : i32, i32
  }
  func.func @transform_2(%arg0: i32) -> (i32, i32) {
    %c0_i32 = arith.constant 0 : i32
    %c0_i32_0 = arith.constant 0 : i32
    return %arg0, %c0_i32 : i32, i32
  }
}

</mosaic_0001>

<bundles_post_ra>
// kernel: tpu_custom_call.1
= control target key start
LH: loop header
LB: loop body
LE: loop exit
PB: predicated region body
PF: predicated region fallthrough
CT: control target
= control target key end

     0   :  { %7 = vsyncpa [#allocation3], 0  ;;  %s303_s0 = inlined_call_operand.hbm [shape: f32[16,32], index: 0, kind: input, shape index: {}]   ;;  %s304_s1 = inlined_call_operand.hbm [shape: f32[32,128], index: 1, kind: input, shape index: {}]   ;;  %s305_s2 = inlined_call_operand.hbm [shape: bf16[16,128], index: 2, kind: output, shape index: {}]  }
   0x1   :  { %8 = vsyncpa [#allocation6], 0 }
   0x2   :  { %9 = vsyncpa [#allocation4], 0  ;;  %s269_s9 = smov [#allocation2]  }
   0x3   :  { %s15_s10 = sshll.u32 %s269_s9, 4  ;;  %s16_s10 = int_to_ptr.vmem [resolvable:$true] %s15_s10 }
   0x4   :  { %s211_s11 = scalar_lea.vmem %s16_s10, 256  ;;  %p216_p1 = scmp.lt.s32.totalorder %s16_s10, %s16_s10 }
   0x5   :  { %p212_p0 = scmp.ne.s32.totalorder %s16_s10, %s211_s11  ;;  %p217_p2 = scmp.lt.s32.totalorder %s211_s11, %s211_s11 }
   0x7   :  { %p218_p3 = por %p217_p2, %p216_p1 }
   0x9   :  { %p219_p4 = pnand %p218_p3, %p212_p0 }
   0xb   :  { %222 = shalt.err (!%p219_p4)
}
   0xc   :  { %s270_s12 = smov 128   ;;  %s271_s13 = smov 8  }
   0xd   :  { %21 = dma.hbm_to_vmem [thread:$0]  %s303_s0, 256, %s16_s10, [#allocation3], %s270_s12, %s270_s12, %s271_s13  }
   0xe   :  { %s272_s16 = smov [#allocation5]  }
   0xf   :  { %s27_s17 = sshll.u32 %s272_s16, 4  ;;  %s28_s17 = int_to_ptr.vmem [resolvable:$true] %s27_s17 }
  0x10   :  { %s231_s18 = scalar_lea.vmem %s28_s17, 512  ;;  %p236_p6 = scmp.lt.s32.totalorder %s28_s17, %s28_s17 }
  0x11   :  { %p232_p5 = scmp.ne.s32.totalorder %s28_s17, %s231_s18  ;;  %p237_p7 = scmp.lt.s32.totalorder %s231_s18, %s231_s18 }
  0x13   :  { %p238_p8 = por %p237_p7, %p236_p6 }
  0x15   :  { %p239_p9 = pnand %p238_p8, %p232_p5 }
  0x17   :  { %242 = shalt.err (!%p239_p9)
}
  0x18   :  { %33 = dma.hbm_to_vmem [thread:$0]  %s304_s1, 512, %s28_s17, [#allocation6], %s270_s12, %s270_s12, %s271_s13  }
  0x19   :  { %263 = dma.done.wait [#allocation3], 256  }
  0x1a   :  { %264 = vsyncadd [#allocation3], 4294967040 }
  0x1b   :  { %265 = dma.done.wait [#allocation6], 512  }
  0x1c   :  { %266 = vsyncadd [#allocation6], 4294966784  ;;  %vm46_vm0 = vcmask 261120   ;;  %v45_v0 = vld [vmem:[#allocation5 + $0x18] sm:$0xff]  ;;  %v44_v1 = vld [vmem:[#allocation5 + $0x10] sm:$0xff]  ;;  %s274_s0 = smov [#allocation7]  }
  0x1d   :  { %184 = vmatprep.subr.mxu0 %v45_v0  ;;  %v40_v2 = vld [vmem:[#allocation2] sm:$0xff]  ;;  %v43_v3 = vld [vmem:[#allocation5 + $0x8] sm:$0xff]  ;;  %v42_v4 = vld [vmem:[#allocation5] sm:$0xff]  ;;  %v273_v6 = vmov 9.9824435e+08|9.9824435e+08   ;;  %s154_s1 = sshll.u32 %s274_s0, 4  ;;  %s155_s1 = int_to_ptr.vmem [resolvable:$true] %s154_s1 }
  0x1e   :  { %185 = vmatpush3.msra.mxu0 %v45_v0  ;;  %192 = vmatprep.mubr.msk.f32.mxu0 %vm46_vm0, %v40_v2  ;;  %v41_v5 = vld [vmem:[#allocation2 + $0x8] sm:$0xff]  ;;  %v175_v7 = vunpack.c.l.bf16 %v273_v6  ;;  %s243_s21 = scalar_lea.vmem %s155_s1, 128  ;;  %p248_p11 = scmp.lt.s32.totalorder %s155_s1, %s155_s1 }
  0x1f   :  { %186 = vmatprep.subr.mxu0 %v44_v1  ;;  %p244_p10 = scmp.ne.s32.totalorder %s155_s1, %s243_s21  ;;  %p249_p12 = scmp.lt.s32.totalorder %s243_s21, %s243_s21 }
  0x20   :  { %187 = vmatpush3.msra.mxu0 %v44_v1 }
  0x21   :  { %188 = vmatprep.subr.mxu0 %v43_v3  ;;  %p250_p13 = por %p249_p12, %p248_p11 }
  0x22   :  { %189 = vmatpush3.msra.mxu0 %v43_v3 }
  0x23   :  { %190 = vmatprep.subr.mxu0 %v42_v4  ;;  %p251_p0 = pnand %p250_p13, %p244_p10 }
  0x24   :  { %191 = vmatpush3.msra.mxu0 %v42_v4 }
  0x25   :  { %193 = vmatmul.mubr.msk.f32.vlgmr.msra.gmra.mxu0 %vm46_vm0, %v41_v5 }
  0xe5   :  { %v194_v8 = vpop.f32.mrf.mxu0 }
  0xe7   :  { %v119_v9 = vpop.f32.mrf.mxu0 }
  0xe8   :  { %v176_v10 = vpack.c.bf16 %v175_v7, %v119_v9 }
  0xea   :  { %177 = vst [vmem:[#allocation7] sm:$0xff] %v176_v10  }
  0xeb   :  { %254 = shalt.err (!%p251_p0)
}
  0xec   :  { %s275_s22 = smov 64   ;;  %s276_s23 = smov 4  }
  0xed   :  { %160 = dma.vmem_to_hbm [thread:$0]  %s155_s1, 128, %s305_s2, [#allocation4], %s275_s22, %s275_s22, %s276_s23  }
  0xee   :  { %267 = dma.done.wait [#allocation4], 128  }
  0xef   :  { %268 = vsyncadd [#allocation4], 4294967168 }
  0xf0   :  { %164 = vsyncpa [#allocation3], 1 }
  0xf1   :  { %165 = vsyncpa [#allocation6], 1 }
  0xf2   :  { %166 = vsyncpa [#allocation4], 1 }

</bundles_post_ra>
